<compile_context>
chip_gen: v7x
topology: tpu7x:2x2x1
jax: 0.10.0
libtpu: 0.0.40
codegen_flags: <defaults>
</compile_context>

<pallas_src>
import jax
import jax.numpy as jnp
from jax.experimental import pallas as pl
from jax.experimental.pallas import tpu as pltpu


_TARGET_BLOCK_BYTES = 4 * 1024 * 1024    # x / out block size (streaming sweet spot)
_BIAS_BLOCK_BYTES = 1 * 1024 * 1024      # cap on the bias block's padded VMEM bytes
_VMEM_LIMIT_BYTES = 32 * 1024 * 1024     # worst-case live ~18-24 MiB; headroom left


def _round_up(x, m):
    return -(-x // m) * m


def _round_down(x, m):
    return (x // m) * m


def _pack_for(*dtypes):
    """Minimum sublane tile: 8 for 32-bit, 16 for 16-bit, 32 for 8-bit dtypes."""
    min_bytes = min(jnp.dtype(d).itemsize for d in dtypes)
    return 8 * max(1, 4 // min_bytes)


# ---------------- kernel (shared by 2D (bn,bc) and 4D (1,bc,thw) blocks) ----


def _add_bias_kernel(x_ref, b_ref, o_ref):
    # Broadcast add; store casts to the (possibly promoted) output dtype.
    o_ref[...] = (x_ref[...] + b_ref[...]).astype(o_ref.dtype)


# ---------------- block planning ----------------


def _plan_2d(N, K, itemsize, pack):
    # bias block (1, bc) pads sublanes to 8 -> 8*bc*itemsize per buffer.
    bc_cap = max(128, _round_down(
        min(_TARGET_BLOCK_BYTES // (pack * itemsize),
            _BIAS_BLOCK_BYTES // (8 * itemsize)), 128))
    bc = K if K <= bc_cap else bc_cap
    bn = max(pack, _round_down(_TARGET_BLOCK_BYTES // (bc * itemsize), pack))
    # Keep >= ~4 total grid steps when N allows (feeds both v7x TensorCores).
    steps_c = -(-K // bc)
    if steps_c < 4 and N > pack:
        want = -(-4 // steps_c)
        bn = min(bn, max(pack, _round_up(-(-N // want), pack)))
    if bn >= N:
        bn = N          # full-dim block: legal regardless of divisibility
    return bn, bc


def _plan_4d(N, C, HW, itemsize, pack):
    # bias block (1, bc, 1) pads lanes to 128 -> bc*128*itemsize per buffer.
    bc_cap = max(pack, _round_down(
        min(_TARGET_BLOCK_BYTES, _BIAS_BLOCK_BYTES) // (128 * itemsize), pack))
    bc = C if C <= bc_cap else bc_cap
    thw = max(128, _round_down(_TARGET_BLOCK_BYTES // (bc * itemsize), 128))
    # Keep >= ~4 total grid steps for v7x megacore when HW allows it.
    steps_nc = N * (-(-C // bc))
    if steps_nc < 4 and HW > 128:
        want = -(-4 // steps_nc)
        thw = min(thw, max(128, _round_up(-(-HW // want), 128)))
    if thw >= HW:
        thw = HW        # full-dim block
    return bc, thw


# ---------------- pallas_call runners ----------------


def _run_rows(x2, bias_row, out_dtype, donate):
    """out[n, k] = x2[n, k] + bias_row[0, k], tiled over rows and (huge) K."""
    N, K = x2.shape
    itemsize = max(jnp.dtype(x2.dtype).itemsize, jnp.dtype(out_dtype).itemsize)
    pack = _pack_for(x2.dtype, bias_row.dtype, out_dtype)
    bn, bc = _plan_2d(N, K, itemsize, pack)

    extra = {}
    if donate and jnp.dtype(x2.dtype) == jnp.dtype(out_dtype):
        extra["input_output_aliases"] = {0: 0}

    return pl.pallas_call(
        _add_bias_kernel,
        out_shape=jax.ShapeDtypeStruct((N, K), out_dtype),
        grid=(pl.cdiv(N, bn), pl.cdiv(K, bc)),
        in_specs=[
            pl.BlockSpec((bn, bc), lambda i, j: (i, j)),
            pl.BlockSpec((1, bc), lambda i, j: (0, j)),   # VMEM-resident when 1 K-tile
        ],
        out_specs=pl.BlockSpec((bn, bc), lambda i, j: (i, j)),
        compiler_params=pltpu.CompilerParams(
            dimension_semantics=("parallel", "parallel"),
            vmem_limit_bytes=_VMEM_LIMIT_BYTES),
        **extra,
    )(x2, bias_row)


def _run_nchw(x3, bias_1c1, out_dtype, donate):
    """out[n, c, s] = x3[n, c, s] + bias[0, c, 0], tiled over (N, C, HW)."""
    N, C, HW = x3.shape
    itemsize = max(jnp.dtype(x3.dtype).itemsize, jnp.dtype(out_dtype).itemsize)
    pack = _pack_for(x3.dtype, bias_1c1.dtype, out_dtype)
    bc, thw = _plan_4d(N, C, HW, itemsize, pack)

    extra = {}
    if donate and jnp.dtype(x3.dtype) == jnp.dtype(out_dtype):
        extra["input_output_aliases"] = {0: 0}

    return pl.pallas_call(
        _add_bias_kernel,
        out_shape=jax.ShapeDtypeStruct((N, C, HW), out_dtype),
        grid=(N, pl.cdiv(C, bc), pl.cdiv(HW, thw)),
        in_specs=[
            pl.BlockSpec((1, bc, thw), lambda n, c, s: (n, c, s)),
            pl.BlockSpec((1, bc, 1), lambda n, c, s: (0, c, 0)),  # not pre-broadcast
        ],
        out_specs=pl.BlockSpec((1, bc, thw), lambda n, c, s: (n, c, s)),
        compiler_params=pltpu.CompilerParams(
            dimension_semantics=("parallel", "parallel", "parallel"),
            vmem_limit_bytes=_VMEM_LIMIT_BYTES),
        **extra,
    )(x3, bias_1c1)


# ---------------- public wrapper ----------------


def add_fixed_bias(x, bias_c1, *, donate=False):
    """Pallas equivalent of AddFixedBias.forward.

    Args:
      x: (N, C) or (N, C, H, W) array.
      bias_c1: the stored parameter, shape (C, 1) (== bias.unsqueeze(1)).
      donate: if True (and dtypes match), alias x's HBM buffer as the output.
    """
    C = bias_c1.shape[0]
    out_dtype = jnp.result_type(x.dtype, bias_c1.dtype)  # PyTorch-style promotion

    if x.ndim == 2:
        N, Cx = x.shape
        assert Cx == C
        bias_row = bias_c1.T.reshape(1, C)          # == bias.t().view(1, -1)
        if C < 128:
            # Lane-sparse output => masked partial stores + call overhead;
            # a fused XLA add is strictly better.
            return (x + bias_row).astype(out_dtype)
        return _run_rows(x, bias_row, out_dtype, donate)

    elif x.ndim == 4:
        N, Cx, H, W = x.shape
        assert Cx == C
        HW = H * W
        bias_flat = bias_c1.reshape(C)

        if HW < 128:
            # Lane-sparse spatial dim (e.g. 7x7 CNN tails): flatten C*HW into
            # a lane-dense row and reuse the 2D kernel with a pre-tiled bias.
            K = C * HW
            if K < 128:
                return (x + bias_flat.reshape(1, C, 1, 1)).astype(out_dtype)
            x2 = x.reshape(N, K)
            bias_row = jnp.repeat(bias_flat, HW).reshape(1, K)
            out2 = _run_rows(x2, bias_row, out_dtype, donate)
            return out2.reshape(N, C, H, W)

        x3 = x.reshape(N, C, HW)                    # lane-dense last dim
        bias_1c1 = bias_c1.reshape(1, C, 1)         # no in-kernel broadcast op re-emitted
        out3 = _run_nchw(x3, bias_1c1, out_dtype, donate)
        return out3.reshape(N, C, H, W)

    else:
        raise ValueError(f"AddFixedBias expects 2D or 4D input, got {x.ndim}D")


if __name__ == "__main__":
    key = jax.random.PRNGKey(0)
    k2a, k2b, k4, k4s = jax.random.split(key, 4)

    # --- 4D path (N, C, H, W), lane-dense spatial ---
    N, C, H, W = 2, 4, 16, 16
    bias4 = jnp.arange(C, dtype=jnp.float32) * 0.5 - 1.0
    bias4_c1 = bias4[:, None]                      # (C, 1) == bias.unsqueeze(1)
    x4d = jax.random.normal(k4, (N, C, H, W), dtype=jnp.float32)

    out4d = jax.block_until_ready(add_fixed_bias(x4d, bias4_c1))
    ref4d = x4d + bias4.reshape(1, C, 1, 1)
    assert out4d.shape == (N, C, H, W)
    assert jnp.allclose(out4d, ref4d, atol=1e-6), "4D path mismatch"

    # --- 4D path, lane-sparse spatial (HW < 128) -> flattened 2D kernel ---
    Ns, Cs, Hs, Ws = 2, 32, 3, 3
    bias_s = jnp.linspace(-0.5, 0.5, Cs, dtype=jnp.float32)
    x4s = jax.random.normal(k4s, (Ns, Cs, Hs, Ws), dtype=jnp.float32)
    out4s = jax.block_until_ready(add_fixed_bias(x4s, bias_s[:, None]))
    ref4s = x4s + bias_s.reshape(1, Cs, 1, 1)
    assert jnp.allclose(out4s, ref4s, atol=1e-6), "4D lane-sparse path mismatch"

    # --- 2D path, lane-dense C (exercises the Pallas row kernel) ---
    N2, C2 = 16, 128
    bias2 = jnp.linspace(-1.0, 1.0, C2, dtype=jnp.float32)
    x2d = jax.random.normal(k2a, (N2, C2), dtype=jnp.float32)
    out2d = jax.block_until_ready(add_fixed_bias(x2d, bias2[:, None]))
    ref2d = x2d + bias2.reshape(1, C2)
    assert out2d.shape == (N2, C2)
    assert jnp.allclose(out2d, ref2d, atol=1e-6), "2D path mismatch"

    # --- 2D path, tiny C (takes the lane-sparse fallback, same semantics) ---
    x2d_small = jax.random.normal(k2b, (N, C), dtype=jnp.float32)
    out2d_small = jax.block_until_ready(add_fixed_bias(x2d_small, bias4_c1))
    ref2d_small = x2d_small + bias4.reshape(1, C)
    assert jnp.allclose(out2d_small, ref2d_small, atol=1e-6), "2D small-C mismatch"

    print("KERNEL_OK")
</pallas_src>

<mosaic_0001>
module attributes {stable_mosaic.version = 11 : i64} {
  func.func @_add_bias_kernel(%arg0: i32, %arg1: i32, %arg2: i32, %arg3: memref<1x4x128xf32, #tpu.memory_space<vmem>>, %arg4: memref<1x4x1xf32, #tpu.memory_space<vmem>>, %arg5: memref<1x4x128xf32, #tpu.memory_space<vmem>>) attributes {dimension_semantics = [#tpu.dimension_semantics<parallel>, #tpu.dimension_semantics<parallel>, #tpu.dimension_semantics<parallel>], iteration_bounds = array<i64: 2, 1, 2>, scalar_prefetch = 0 : i64, scratch_operands = 0 : i64, tpu.core_type = #tpu.core_type<tc>, window_params = [{transform_indices = @transform_0, window_bounds = array<i64: 1, 4, 128>}, {transform_indices = @transform_1, window_bounds = array<i64: 1, 4, 1>}, {transform_indices = @transform_2, window_bounds = array<i64: 1, 4, 128>}]} {
    %c0 = arith.constant 0 : index
    %c0_0 = arith.constant 0 : index
    %c0_1 = arith.constant 0 : index
    %0 = vector.load %arg3[%c0, %c0_0, %c0_1] : memref<1x4x128xf32, #tpu.memory_space<vmem>>, vector<1x4x128xf32>
    %c0_2 = arith.constant 0 : index
    %c0_3 = arith.constant 0 : index
    %c0_4 = arith.constant 0 : index
    %1 = vector.load %arg4[%c0_2, %c0_3, %c0_4] : memref<1x4x1xf32, #tpu.memory_space<vmem>>, vector<1x4x1xf32>
    %2 = vector.broadcast %1 : vector<1x4x1xf32> to vector<1x4x128xf32>
    %3 = arith.addf %0, %2 : vector<1x4x128xf32>
    %c0_5 = arith.constant 0 : index
    %c0_6 = arith.constant 0 : index
    %c0_7 = arith.constant 0 : index
    %4 = vector.load %arg5[%c0_5, %c0_6, %c0_7] : memref<1x4x128xf32, #tpu.memory_space<vmem>>, vector<1x4x128xf32>
    tpu.vector_store %arg5[%c0_5, %c0_6, %c0_7], %3 {strides = array<i32>} : memref<1x4x128xf32, #tpu.memory_space<vmem>>, vector<1x4x128xf32>,
    return
  }
  func.func @transform_0(%arg0: i32, %arg1: i32, %arg2: i32) -> (i32, i32, i32) {
    %c0_i32 = arith.constant 0 : i32
    return %arg0, %arg1, %arg2 : i32, i32, i32
  }
  func.func @transform_1(%arg0: i32, %arg1: i32, %arg2: i32) -> (i32, i32, i32) {
    %c0_i32 = arith.constant 0 : i32
    %c0_i32_0 = arith.constant 0 : i32
    %c0_i32_1 = arith.constant 0 : i32
    return %c0_i32, %arg1, %c0_i32_0 : i32, i32, i32
  }
  func.func @transform_2(%arg0: i32, %arg1: i32, %arg2: i32) -> (i32, i32, i32) {
    %c0_i32 = arith.constant 0 : i32
    return %arg0, %arg1, %arg2 : i32, i32, i32
  }
}

</mosaic_0001>

<bundles_post_ra>
// kernel: tpu_custom_call.1
= control target key start
LH: loop header
LB: loop body
LE: loop exit
PB: predicated region body
PF: predicated region fallthrough
CT: control target
= control target key end

     0   :  { %7 = vsyncpa [#allocation3], 0  ;;  %s782_s0 = inlined_call_operand.hbm [shape: f32[2,4,256], index: 0, kind: input, shape index: {}]   ;;  %s783_s1 = inlined_call_operand.vmem [shape: f32[1,4,1], index: 1, kind: input, shape index: {}]   ;;  %s784_s2 = inlined_call_operand.hbm [shape: f32[2,4,256], index: 2, kind: output, shape index: {}]  }
   0x1   :  { %9 = vsyncpa [#allocation3 + $0x1], 0 }
   0x2   :  { %10 = vsyncpa [#allocation4], 0 }
   0x3   :  { %12 = vsyncpa [#allocation4 + $0x1], 0  ;;  %s585_s9 = smov 0   ;;  %s587_s10 = smov 0  }
   0x4   :  { %s589_s11 = smov 0   ;;  %s591_s12 = smov 0  }
   0x5   :  { %s593_s13 = smov 0   ;;  %s595_s14 = smov 0  }
   0x6   :  { %s597_s15 = smov 0   ;;  %s599_s16 = smov 0  }
   0x7 LB: > { %s341_s17 = sadd.s32 4294967295, %s565_s16   ;;  %s342_s18 = sadd.s32 4294967294, %s565_s16   ;;  %s565_s16 = sphi %s599_s16, %s18_s16   ;;  %s561_s15 = sphi %s597_s15, %s801_s15   ;;  %s557_s14 = sphi %s595_s14, %s800_s14   ;;  %s553_s13 = sphi %s593_s13, %s799_s13   ;;  %s549_s12 = sphi %s591_s12, %s798_s12   ;;  %s545_s11 = sphi %s589_s11, %s797_s11   ;;  %s541_s10 = sphi %s587_s10, %s796_s10   ;;  %s537_s9 = sphi %s585_s9, %s795_s9  }
   0x8   : > { %s30_s19 = sadd.s32 1, %s557_s14  ;;  %s37_s20 = sadd.s32 1, %s561_s15 }
   0x9   : > { %p31_p0 = scmp.ge.s32.totalorder %s30_s19, 2  ;;  %s48_s21 = sadd.s32 1, %s545_s11 }
   0xa   : > { %p55_p1 = scmp.ne.s32.totalorder %s545_s11, %s541_s10  ;;  %p56_p2 = scmp.eq.s32.totalorder %s565_s16, 0 }
   0xb   : > { %s803_s19 = smov (%p31_p0, %s30_s19), 0  ;;  %s805_s20 = smov (!%p31_p0, %s37_s20), %s561_s15 }
   0xc   : > { %s44_s22 = ssub.s32 %s557_s14, %s803_s19  ;;  %p638_p3 = por %p56_p2, %p55_p1 }
   0xd   : > { %p39_p4 = scmp.ge.s32.totalorder %s805_s20, 2  ;;  %p61_p5 = scmp.ne.s32.totalorder %s541_s10, %s537_s9 }
   0xe   : > { %p62_p6 = scmp.eq.s32.totalorder %s341_s17, 0  ;;  %p115_p7 = scmp.eq.s32.totalorder %s341_s17, 3 }
   0xf   : > { %s807_s20 = smov (%p39_p4, %s805_s20), 0  ;;  %p121_p10 = scmp.eq.s32.totalorder %s342_s18, 3 }
  0x10   : > { %p646_p8 = por %p62_p6, %p61_p5  ;;  %p650_p9 = por %p115_p7, %p55_p1 }
  0x11   : > { %s41_s26 = ssub.s32 %s561_s15, %s807_s20  ;;  %p656_p12 = por %p121_p10, %p61_p5 }
  0x12   : > { %s788_s25 = scalar_select %p650_p9, 1, 0 }
  0x13   : > { %s45_s27 = sor.u32 %s44_s22, %s41_s26  ;;  %p369_p13 = scmp.lt.s32.totalorder %s565_s16, 4 }
  0x14   : > { %p46_p11 = scmp.eq.s32.totalorder %s45_s27, 0  ;;  %s148_s29 = sand.u32 1, %s545_s11  }
  0x15   : > { %s789_s28 = scalar_select %p656_p12, 1, 0 }
  0x16   : > { %s663_s30 = scalar_select %p46_p11, %s545_s11, %s48_s21  }
  0x17   : > { %s346_s3 = sshll.u32 %s148_s29, 2  ;;  %s347_s4 = sshll.u32 %s561_s15, 1 }
  0x18   : > { %s159_s5 = sadd.s32 %s557_s14, %s347_s4  ;;  %s152_s6 = scalar_lea.vmem [#allocation2], %s346_s3 }
  0x19   : > { %s163_s7 = sshll.u32 %s152_s6, 4  ;;  %s348_s8 = sshll.u32 %s159_s5, 6  ;;  %s667_s7 = int_to_ptr.vmem [resolvable:$true] %s163_s7 }
  0x1a   : > { %s672_s22 = scalar_lea.hbm %s782_s0, %s348_s8  ;;  %p676_p0 = pnand %p369_p13, %p638_p3 }
  0x1b   : > { %s149_s26 = scalar_lea.sflag [#allocation3], %s148_s29  ;;  %s437_s27 = scalar_lea.hbm %s672_s22, 64 }
  0x1c   : > { %p438_p4 = scmp.ne.s32.totalorder %s672_s22, %s437_s27  ;;  %p439_p5 = pneg %p676_p0 }
  0x1d   : > { %s442_s4 = scalar_lea.hbm %s782_s0, 256  ;;  %p443_p3 = scmp.lt.u32.totalorder %s672_s22, %s782_s0 }
  0x1e   : > { %p440_p6 = pnand %p439_p5, %p438_p4  ;;  %p444_p10 = scmp.lt.u32.totalorder %s442_s4, %s437_s27 }
  0x1f   : > { %p446_p13 = scmp.lt.u32.totalorder %s437_s27, %s672_s22 }
  0x20   : > { %p441_p7 = pneg %p440_p6  ;;  %p445_p11 = por %p444_p10, %p443_p3 }
  0x22   : > { %p447_p1 = por %p446_p13, %p445_p11 }
  0x24   : > { %p448_p2 = pnand %p447_p1, %p441_p7 }
  0x26   : > { %451 = shalt.err (!%p448_p2)
}
  0x27   : > { %s452_s29 = scalar_lea.vmem %s667_s7, 64  ;;  %s567_s8 = smov [#allocation2]  }
  0x28   : > { %p453_p4 = scmp.ne.s32.totalorder %s667_s7, %s452_s29  ;;  %s457_s17 = sshll.u32 %s567_s8, 4  ;;  %s458_s17 = int_to_ptr.vmem [resolvable:$false] %s457_s17 }
  0x29   : > { %s459_s18 = scalar_lea.vmem %s458_s17, 128  ;;  %p460_p9 = scmp.lt.s32.totalorder %s667_s7, %s458_s17 }
  0x2a   : > { %p455_p6 = pnand %p453_p4, %p439_p5  ;;  %p461_p3 = scmp.lt.s32.totalorder %s459_s18, %s452_s29 }
  0x2c   : > { %p456_p12 = pneg %p455_p6  ;;  %p462_p10 = por %p461_p3, %p460_p9 }
  0x2e   : > { %p463_p11 = pnand %p462_p10, %p456_p12 }
  0x30   : > { %466 = shalt.err (!%p463_p11)
}
  0x31   : > { %364 = dma.hbm_to_vmem [thread:$0]  (!%p676_p0), %s672_s22, 64, %s667_s7, %s149_s26  }
  0x32   : > { %p791_p1 = scmp.lt.s32.totalorder %s565_s16, 5  ;;  %p792_p2 = scmp.ge.s32.totalorder %s565_s16, 1 }
  0x34   : > { %p169_p5 = pnand %p792_p2, %p791_p1 }
  0x35   : > { %s712_s27 = sand.u32 (!%p169_p5), 1, %s541_s10  }
  0x36   : > { %172 = sbr.rel (%p169_p5) target bundleno = 208 (0xd0), region = 28  ;;  %s350_s23 = sshll.u32 (!%p169_p5), %s712_s27, 2 }
  0x37   : > { %s175_s3 = scalar_lea.sflag (!%p169_p5), [#allocation3], %s712_s27  ;;  %s178_s4 = scalar_lea.vmem (!%p169_p5), [#allocation2], %s350_s23 }
  0x3d   : > { %528 = dma.done.wait (%p646_p8), %s175_s3, 64  }
  0x3e   : > { %530 = vsyncadd (%p646_p8), %s175_s3, 4294967232  ;;  %v568_v0 = vmov 0   ;;  %v208_v1 = vld [vmem:[%s783_s1] sm:$0xf]  ;;  %s353_s21 = sshll.u32 %s553_s13, 1  ;;  %s202_s6 = scalar_lea.vmem [#allocation5], %s350_s23 }
  0x3f   : > { %436 = vset.pattern.permute.xlu0 %v568_v0  ;;  %s230_s26 = sadd.s32 %s549_s12, %s353_s21  ;;  %v207_v2 = vld [vmem:[%s178_s4] sm:$0xf]  ;;  %s234_s29 = sshll.u32 %s202_s6, 4  ;;  %s730_s29 = int_to_ptr.vmem [resolvable:$true] %s234_s29 }
  0x40   : > { %211 = vperm.xlu0 %436, %v208_v1   ;;  %s354_s5 = sshll.u32 %s230_s26, 6  ;;  %s217_s18 = scalar_lea.sflag [#allocation4], %s712_s27 }
  0x41   : > { %s728_s17 = scalar_lea.hbm %s784_s2, %s354_s5  ;;  %s467_s13 = scalar_lea.vmem %s730_s29, 64 }
  0x42   : > { %p468_p8 = scmp.ne.s32.totalorder %s730_s29, %s467_s13  ;;  %p793_p9 = scmp.ne.s32.totalorder %s788_s25, 0 }
  0x43   : > { %s569_s12 = smov [#allocation5]  }
  0x44   : > { %p469_p12 = pnand %p468_p8, %p793_p9  ;;  %s471_s23 = sshll.u32 %s569_s12, 4  ;;  %s472_s23 = int_to_ptr.vmem [resolvable:$false] %s471_s23 }
  0x45   : > { %s473_s3 = scalar_lea.vmem %s472_s23, 128  ;;  %p474_p7 = scmp.lt.s32.totalorder %s730_s29, %s472_s23 }
  0x46   : > { %p470_p0 = pneg %p469_p12  ;;  %p475_p13 = scmp.lt.s32.totalorder %s473_s3, %s467_s13 }
  0x48   : > { %p476_p4 = por %p475_p13, %p474_p7 }
  0x4a   : > { %p477_p6 = pnand %p476_p4, %p470_p0 }
  0xbf   : > { %v212_v3 = vpop.permute.xlu0 %211 }
  0xc0   : > { %v214_v4 = vadd.f32 %v212_v3, %v207_v2 }
  0xc2   : > { %215 = vst [vmem:[%s202_s6] sm:$0xf] %v214_v4 }
  0xc3   : > { %480 = shalt.err (!%p477_p6)
}
  0xc4   : > { %s481_s27 = scalar_lea.hbm %s728_s17, 64  ;;  %s485_s22 = scalar_lea.hbm %s784_s2, 256 }
  0xc5   : > { %p482_p3 = scmp.ne.s32.totalorder %s728_s17, %s481_s27  ;;  %p486_p1 = scmp.lt.u32.totalorder %s728_s17, %s784_s2 }
  0xc6   : > { %p487_p2 = scmp.lt.u32.totalorder %s485_s22, %s481_s27  ;;  %p489_p8 = scmp.lt.u32.totalorder %s481_s27, %s728_s17 }
  0xc7   : > { %p483_p10 = pnand %p482_p3, %p793_p9 }
  0xc8   : > { %p488_p5 = por %p487_p2, %p486_p1 }
  0xc9   : > { %p484_p11 = pneg %p483_p10 }
  0xca   : > { %p490_p12 = por %p489_p8, %p488_p5 }
  0xcc   : > { %p491_p0 = pnand %p490_p12, %p484_p11 }
  0xce   : > { %494 = shalt.err (!%p491_p0)
}
  0xcf   : > { %359 = dma.vmem_to_hbm [thread:$0]  (%p793_p9), %s730_s29, 64, %s728_s17, %s217_s18  }
  0xd0 PF: > { %p370_p7 = scmp.ge.s32.totalorder %s565_s16, 2  ;;  %s246_s5 = sand.u32 1, %s537_s9  }
  0xd1   : > { %p794_p13 = scmp.ne.s32.totalorder %s789_s28, 0  ;;  %s247_s6 = scalar_lea.sflag [#allocation4], %s246_s5 }
  0xd3   : > { %p366_p4 = pnand %p370_p7, %p794_p13 }
  0xd5   : > { %532 = dma.done.wait (!%p366_p4), %s247_s6, 64  }
  0xd6   : > { %534 = vsyncadd (!%p366_p4), %s247_s6, 4294967232  ;;  %s18_s16 = sadd.s32 1, %s565_s16   ;;  %s795_s9 = smov %s541_s10 }
  0xd7   : > { %p15_p6 = scmp.ge.s32.totalorder %s18_s16, 6   ;;  %s796_s10 = smov %s545_s11 }
  0xd8   : > { %s797_s11 = smov %s663_s30  ;;  %s798_s12 = smov %s557_s14 }
  0xd9   : > { %s799_s13 = smov %s561_s15  ;;  %s800_s14 = smov %s803_s19 }
  0xda   : > { %s801_s15 = smov %s807_s20  ;;  %17 = sbr.rel (!%p15_p6) target bundleno = 7 (0x7), region = 76 }
  0xe1   :  { %252 = vsyncpa [#allocation3], 1 }
  0xe2   :  { %254 = vsyncpa [#allocation3 + $0x1], 1 }
  0xe3   :  { %255 = vsyncpa [#allocation4], 1 }
  0xe4   :  { %257 = vsyncpa [#allocation4 + $0x1], 1 }

</bundles_post_ra>
